<compile_context>
chip_gen: v6e
topology: v6e:2x2x1
jax: 0.10.0
libtpu: 0.0.40
codegen_flags: <defaults>
</compile_context>

<pallas_src>
import math
import functools
from typing import NamedTuple

import jax
import jax.numpy as jnp
from jax import lax
from jax.experimental import pallas as pl
from jax.experimental.pallas import tpu as pltpu

_INV_SQRT_2 = 1.0 / math.sqrt(2.0)
_TANH_C = math.sqrt(2.0 / math.pi)


def _round_up(x, m):
    return ((x + m - 1) // m) * m


# ---------------------------------------------------------------------------
# Device-aware tile planning
# ---------------------------------------------------------------------------

def _vmem_capacity_bytes():
    try:
        return int(pltpu.get_tpu_info().vmem_capacity_bytes)
    except Exception:
        return 64 * 1024 * 1024          # v7x-safe fallback


def _vmem_budget():
    cap = _vmem_capacity_bytes()
    # ~75% of physical VMEM (96 MiB on v5e/v6e, 48 MiB on v7x), always leaving
    # at least 8 MiB of headroom for Mosaic internal scratch.
    return max(16 * 1024 * 1024, min(cap * 3 // 4, cap - 8 * 1024 * 1024))


def _plan_bytes(tm, ti, hp, itemsize):
    """Pipelined VMEM footprint of one grid step (double-buffered blocks)."""
    b = 2 * tm * hp * itemsize              # x tile
    b += 2 * 2 * hp * ti * itemsize         # W1a + W1b tiles
    b += 2 * ti * hp * itemsize             # W2 tile
    b += 2 * 8 * (2 * ti + hp) * 4          # f32 biases (sublane-padded rows)
    b += 2 * tm * hp * itemsize             # out tile
    b += tm * hp * 4                        # f32 accumulator scratch
    return b


def _row_tile_target(itemsize):
    # Weights re-stream once per row tile, so arithmetic intensity is
    # ~2*tm/itemsize flop/byte: big row tiles are what buy back HBM bandwidth.
    return 1024 if itemsize <= 2 else 512


def _plan_inner(H, I, itemsize, block_inner, budget):
    """Choose inner (I) chunk width tI and padded sizes.  Runs once per model."""
    Hp = _round_up(H, 128)
    I128 = _round_up(max(I, 1), 128)
    if block_inner is not None:
        tI = _round_up(max(block_inner, 1), 128)
        return tI, _round_up(I, tI), Hp

    tm_nom = _row_tile_target(itemsize)
    # Weight-resident fast path: all of W1a/W1b/W2 live in VMEM alongside a
    # full-size row tile -> inner grid axis degenerates to one step and the
    # weights are read from HBM exactly once per call, independent of M.
    if _plan_bytes(tm_nom, I128, Hp, itemsize) <= budget:
        return I128, I128, Hp

    # Otherwise stream the inner dimension in chunks.  tI only changes the
    # number of reduction steps (not total weight bytes), so shrink it first
    # and floor it at 256 (full MXU column width on v6e/v7x); only drop to 128
    # if VMEM is still short even with a 128-row tile (v5e-style fallback).
    tI = min(1024, I128)
    floor = min(256, I128)
    while tI > floor and _plan_bytes(tm_nom, tI, Hp, itemsize) > budget:
        tI = max(floor, _round_up(tI // 2, 128))
    while tI > 128 and _plan_bytes(128, tI, Hp, itemsize) > budget:
        tI = max(128, tI - 128)
    return tI, _round_up(I, tI), Hp


# ---------------------------------------------------------------------------
# Kernel
# ---------------------------------------------------------------------------

def _mlp_kernel(x_ref, w1a_ref, w1b_ref, b1a_ref, b1b_ref, w2_ref, b2_ref,
                o_ref, acc_ref, *, approximate_gelu=False):
    """One (row-tile, inner-chunk) step of the fused GEGLU MLP."""
    j = pl.program_id(1)

    @pl.when(j == 0)
    def _():
        # Seed the accumulator with the output bias -> epilogue is a pure cast.
        acc_ref[...] = jnp.broadcast_to(b2_ref[...].astype(jnp.float32),
                                        acc_ref.shape)

    x = x_ref[...]                                          # [tm, Hp], MXU dtype
    # First linear, split into the two GEGLU halves for this inner chunk.
    h1 = jnp.dot(x, w1a_ref[...], preferred_element_type=jnp.float32)
    h1 = h1 + b1a_ref[...]                                  # [tm, tI] f32
    h2 = jnp.dot(x, w1b_ref[...], preferred_element_type=jnp.float32)
    h2 = h2 + b1b_ref[...]                                  # [tm, tI] f32

    if approximate_gelu:
        # tanh approximation (EUP path); deviates slightly from torch default.
        gelu_h2 = 0.5 * h2 * (1.0 + jnp.tanh(_TANH_C *
                                             (h2 + 0.044715 * h2 * h2 * h2)))
    else:
        # exact erf GELU, matching torch.nn.functional.gelu default
        gelu_h2 = 0.5 * h2 * (1.0 + lax.erf(h2 * _INV_SQRT_2))

    act = (h1 * gelu_h2).astype(w2_ref.dtype)               # back to MXU dtype

    # Second linear: accumulate this inner chunk's contribution in f32.
    acc_ref[...] += jnp.dot(act, w2_ref[...], preferred_element_type=jnp.float32)

    @pl.when(j == pl.num_programs(1) - 1)
    def _():
        o_ref[...] = acc_ref[...].astype(o_ref.dtype)


# ---------------------------------------------------------------------------
# One-time weight preparation (hoisted out of the per-call forward)
# ---------------------------------------------------------------------------

class PreparedMLP(NamedTuple):
    w1a: jax.Array      # [Hp, Ip]  first-linear weights, x1 half (compute dtype)
    w1b: jax.Array      # [Hp, Ip]  first-linear weights, x2 half
    b1a: jax.Array      # [1, Ip]   f32
    b1b: jax.Array      # [1, Ip]   f32
    w2: jax.Array       # [Ip, Hp]  second-linear weights (compute dtype)
    b2: jax.Array       # [1, Hp]   f32
    hidden_size: int
    inner_size: int
    tile_inner: int     # tI used for padding Ip (inner grid = Ip // tI)


def prepare_mlp_params(w1, b1, w2, b2, *, block_inner=None, compute_dtype=None):
    """Split / transpose / pad / cast the weights ONCE (outside the hot path).

    Layouts match torch.nn.Linear:  w1: [2*I, H], b1: [2*I], w2: [H, I], b2: [H].
    `compute_dtype=jnp.bfloat16` runs the MXU in bf16 (f32 accumulation kept).
    """
    two_I, H = w1.shape
    I = two_I // 2
    assert w2.shape == (H, I), (w2.shape, (H, I))
    cdt = jnp.dtype(compute_dtype) if compute_dtype is not None else jnp.dtype(w1.dtype)
    itemsize = cdt.itemsize

    tI, Ip, Hp = _plan_inner(H, I, itemsize, block_inner, _vmem_budget())

    w1_t = jnp.asarray(w1).T.astype(cdt)                    # [H, 2I]
    w1a = jnp.pad(w1_t[:, :I], ((0, Hp - H), (0, Ip - I)))  # [Hp, Ip]
    w1b = jnp.pad(w1_t[:, I:], ((0, Hp - H), (0, Ip - I)))  # [Hp, Ip]
    w2p = jnp.pad(jnp.asarray(w2).T.astype(cdt), ((0, Ip - I), (0, Hp - H)))
    b1f = jnp.asarray(b1).astype(jnp.float32)
    b1a = jnp.pad(b1f[:I], (0, Ip - I)).reshape(1, Ip)
    b1b = jnp.pad(b1f[I:], (0, Ip - I)).reshape(1, Ip)
    b2p = jnp.pad(jnp.asarray(b2).astype(jnp.float32), (0, Hp - H)).reshape(1, Hp)

    return PreparedMLP(w1a=w1a, w1b=w1b, b1a=b1a, b1b=b1b, w2=w2p, b2=b2p,
                       hidden_size=H, inner_size=I, tile_inner=tI)


# ---------------------------------------------------------------------------
# Forward
# ---------------------------------------------------------------------------

@functools.partial(jax.jit, static_argnames=("tm", "tI", "approximate_gelu"))
def _mlp_forward_jit(x, w1a, w1b, b1a, b1b, w2p, b2p, *, tm, tI, approximate_gelu):
    orig_shape = x.shape
    H = orig_shape[-1]
    Hp, Ip = w1a.shape
    compute_dtype = w1a.dtype
    itemsize = jnp.dtype(compute_dtype).itemsize

    M = 1
    for d in orig_shape[:-1]:
        M *= d
    Mp = _round_up(max(M, 1), tm)

    x2d = x.reshape(M, H).astype(compute_dtype)
    x2d = jnp.pad(x2d, ((0, Mp - M), (0, Hp - H)))

    grid = (Mp // tm, Ip // tI)
    n_row, n_inner = grid

    # Honest HBM cost: weights re-stream once per row tile when the inner
    # dimension is chunked; exactly once when fully weight-resident.
    weight_bytes = itemsize * (2 * Hp * Ip + Ip * Hp)
    bytes_accessed = (itemsize * 2 * Mp * Hp
                      + weight_bytes * (n_row if n_inner > 1 else 1)
                      + 4 * (2 * Ip + Hp))
    cost = pl.CostEstimate(flops=6 * Mp * Hp * Ip,
                           transcendentals=Mp * Ip,
                           bytes_accessed=int(bytes_accessed))

    cap = _vmem_capacity_bytes()
    need = _plan_bytes(tm, tI, Hp, itemsize)
    vmem_limit = int(max(16 * 1024 * 1024,
                         min(cap, 128 * 1024 * 1024,
                             need + need // 4 + (4 << 20))))

    kernel = functools.partial(_mlp_kernel, approximate_gelu=approximate_gelu)

    out = pl.pallas_call(
        kernel,
        out_shape=jax.ShapeDtypeStruct((Mp, Hp), x.dtype),
        grid_spec=pltpu.PrefetchScalarGridSpec(
            num_scalar_prefetch=0,
            grid=grid,
            in_specs=[
                pl.BlockSpec((tm, Hp), lambda i, j: (i, 0)),   # x rows
                pl.BlockSpec((Hp, tI), lambda i, j: (0, j)),   # W1 (x1 half) chunk
                pl.BlockSpec((Hp, tI), lambda i, j: (0, j)),   # W1 (x2 half) chunk
                pl.BlockSpec((1, tI), lambda i, j: (0, j)),    # b1 (x1 half) chunk
                pl.BlockSpec((1, tI), lambda i, j: (0, j)),    # b1 (x2 half) chunk
                pl.BlockSpec((tI, Hp), lambda i, j: (j, 0)),   # W2 chunk
                pl.BlockSpec((1, Hp), lambda i, j: (0, 0)),    # b2 (grid-invariant)
            ],
            out_specs=pl.BlockSpec((tm, Hp), lambda i, j: (i, 0)),
            scratch_shapes=[pltpu.VMEM((tm, Hp), jnp.float32)],  # f32 accumulator
        ),
        compiler_params=pltpu.CompilerParams(
            dimension_semantics=("parallel", "arbitrary"),
            vmem_limit_bytes=vmem_limit,
        ),
        cost_estimate=cost,
    )(x2d, w1a, w1b, b1a, b1b, w2p, b2p)

    out = out[:M, :H]
    return out.reshape(orig_shape)


def mlp_forward(x, params: PreparedMLP, *, block_m=None, approximate_gelu=False):
    """x: [..., H]; `params` from prepare_mlp_params (weights already prepped)."""
    H = params.hidden_size
    assert x.shape[-1] == H, (x.shape, H)
    M = 1
    for d in x.shape[:-1]:
        M *= d

    itemsize = jnp.dtype(params.w1a.dtype).itemsize
    Hp = params.w1a.shape[0]
    tI = params.tile_inner
    sub = max(8, 32 // itemsize)        # sublane packing: 8 f32, 16 bf16, 32 i8
    budget = _vmem_budget()

    if block_m is not None:
        tm = max(sub, _round_up(block_m, sub))
    else:
        tm = min(_row_tile_target(itemsize), _round_up(max(M, 1), sub))
        while tm > sub and _plan_bytes(tm, tI, Hp, itemsize) > budget:
            tm = max(sub, _round_up(tm // 2, sub))

    return _mlp_forward_jit(x, params.w1a, params.w1b, params.b1a, params.b1b,
                            params.w2, params.b2,
                            tm=int(tm), tI=int(tI),
                            approximate_gelu=bool(approximate_gelu))


# ---------------------------------------------------------------------------
# Reference / init helpers
# ---------------------------------------------------------------------------

def init_mlp_params(key, hidden_size, inner_hidden_size=None, dtype=jnp.float32):
    """Deterministic init mirroring nn.Linear's default bounds (torch layouts)."""
    if inner_hidden_size is None:
        inner_hidden_size = 4 * hidden_size
    k1, k2, k3, k4 = jax.random.split(key, 4)

    bound1 = 1.0 / math.sqrt(hidden_size)
    w1 = jax.random.uniform(k1, (2 * inner_hidden_size, hidden_size),
                            dtype=dtype, minval=-bound1, maxval=bound1)
    b1 = jax.random.uniform(k2, (2 * inner_hidden_size,),
                            dtype=dtype, minval=-bound1, maxval=bound1)

    bound2 = 1.0 / math.sqrt(inner_hidden_size)
    w2 = jax.random.uniform(k3, (hidden_size, inner_hidden_size),
                            dtype=dtype, minval=-bound2, maxval=bound2)
    b2 = jax.random.uniform(k4, (hidden_size,),
                            dtype=dtype, minval=-bound2, maxval=bound2)
    return w1, b1, w2, b2


def mlp_reference(x, w1, b1, w2, b2):
    """Pure-JAX reference mirroring the PyTorch module exactly."""
    h = x @ w1.T + b1
    x1, x2 = jnp.split(h, 2, axis=-1)
    h = x1 * (0.5 * x2 * (1.0 + lax.erf(x2 * _INV_SQRT_2)))
    return h @ w2.T + b2


if __name__ == "__main__":
    key = jax.random.PRNGKey(0)
    k_x, k_p, k_x2, k_p2, k_x3, k_p3 = jax.random.split(key, 6)

    # --- Test 1: module defaults (inner = 4*H), weight-resident fast path ---
    batch, seq, hidden = 2, 8, 32            # inner = 128
    x = jax.random.normal(k_x, (batch, seq, hidden), dtype=jnp.float32)
    w1, b1, w2, b2 = init_mlp_params(k_p, hidden)
    params = prepare_mlp_params(w1, b1, w2, b2)          # one-time weight prep
    out = jax.block_until_ready(mlp_forward(x, params))
    ref = mlp_reference(x, w1, b1, w2, b2)
    assert out.shape == ref.shape == (batch, seq, hidden)
    assert jnp.allclose(out, ref, atol=1e-4, rtol=1e-4), (
        float(jnp.max(jnp.abs(out - ref))))

    # --- Test 2: non-128 H, multi-chunk inner reduction, row padding --------
    hidden2, inner2 = 48, 320
    x2 = jax.random.normal(k_x2, (3, 7, hidden2), dtype=jnp.float32)
    p_w1, p_b1, p_w2, p_b2 = init_mlp_params(k_p2, hidden2, inner2)
    params2 = prepare_mlp_params(p_w1, p_b1, p_w2, p_b2, block_inner=128)
    out2 = jax.block_until_ready(mlp_forward(x2, params2, block_m=8))  # grid (3,3)
    ref2 = mlp_reference(x2, p_w1, p_b1, p_w2, p_b2)
    assert out2.shape == ref2.shape == (3, 7, hidden2)
    assert jnp.allclose(out2, ref2, atol=1e-4, rtol=1e-4), (
        float(jnp.max(jnp.abs(out2 - ref2))))

    # --- Test 3: bf16 MXU path (f32 params/activations, bf16 compute) -------
    hidden3, inner3 = 64, 256
    x3 = jax.random.normal(k_x3, (4, 16, hidden3), dtype=jnp.float32)
    q_w1, q_b1, q_w2, q_b2 = init_mlp_params(k_p3, hidden3, inner3)
    params3 = prepare_mlp_params(q_w1, q_b1, q_w2, q_b2,
                                 compute_dtype=jnp.bfloat16)
    out3 = jax.block_until_ready(mlp_forward(x3, params3))
    ref3 = mlp_reference(x3, q_w1, q_b1, q_w2, q_b2)
    assert out3.shape == ref3.shape and out3.dtype == x3.dtype
    assert jnp.allclose(out3, ref3, atol=5e-2, rtol=5e-2), (
        float(jnp.max(jnp.abs(out3 - ref3))))

    print("KERNEL_OK")
</pallas_src>

<mosaic_0001>
module attributes {stable_mosaic.version = 11 : i64} {
  func.func @_mlp_kernel(%arg0: i32, %arg1: i32, %arg2: memref<16x128xf32, #tpu.memory_space<vmem>>, %arg3: memref<128x128xf32, #tpu.memory_space<vmem>>, %arg4: memref<128x128xf32, #tpu.memory_space<vmem>>, %arg5: memref<1x128xf32, #tpu.memory_space<vmem>>, %arg6: memref<1x128xf32, #tpu.memory_space<vmem>>, %arg7: memref<128x128xf32, #tpu.memory_space<vmem>>, %arg8: memref<1x128xf32, #tpu.memory_space<vmem>>, %arg9: memref<16x128xf32, #tpu.memory_space<vmem>>, %arg10: memref<16x128xf32, #tpu.memory_space<vmem>>) attributes {dimension_semantics = [#tpu.dimension_semantics<parallel>, #tpu.dimension_semantics<arbitrary>], iteration_bounds = array<i64: 1, 1>, scalar_prefetch = 0 : i64, scratch_operands = 1 : i64, tpu.core_type = #tpu.core_type<tc>, window_params = [{transform_indices = @transform_0, window_bounds = array<i64: 16, 128>}, {transform_indices = @transform_1, window_bounds = array<i64: 128, 128>}, {transform_indices = @transform_2, window_bounds = array<i64: 128, 128>}, {transform_indices = @transform_3, window_bounds = array<i64: 1, 128>}, {transform_indices = @transform_4, window_bounds = array<i64: 1, 128>}, {transform_indices = @transform_5, window_bounds = array<i64: 128, 128>}, {pipeline_mode = #tpu.pipeline_mode<synchronous>, transform_indices = @transform_6, window_bounds = array<i64: 1, 128>}, {transform_indices = @transform_7, window_bounds = array<i64: 16, 128>}]} {
    %c0_i32 = arith.constant 0 : i32
    %0 = arith.cmpi eq, %arg1, %c0_i32 : i32
    %1 = arith.extui %0 : i1 to i32
    %c0_i32_0 = arith.constant 0 : i32
    %2 = arith.cmpi ne, %1, %c0_i32_0 : i32
    scf.if %2 {
      %c0_23 = arith.constant 0 : index
      %c0_24 = arith.constant 0 : index
      %31 = vector.load %arg8[%c0_23, %c0_24] : memref<1x128xf32, #tpu.memory_space<vmem>>, vector<1x128xf32>
      %32 = vector.shape_cast %31 : vector<1x128xf32> to vector<1x128xf32>
      %33 = vector.broadcast %32 : vector<1x128xf32> to vector<16x128xf32>
      %c0_25 = arith.constant 0 : index
      %c0_26 = arith.constant 0 : index
      %34 = vector.load %arg10[%c0_25, %c0_26] : memref<16x128xf32, #tpu.memory_space<vmem>>, vector<16x128xf32>
      tpu.vector_store %arg10[%c0_25, %c0_26], %33 {strides = array<i32>} : memref<16x128xf32, #tpu.memory_space<vmem>>, vector<16x128xf32>,
    } else {
    }
    %c0 = arith.constant 0 : index
    %c0_1 = arith.constant 0 : index
    %3 = vector.load %arg2[%c0, %c0_1] : memref<16x128xf32, #tpu.memory_space<vmem>>, vector<16x128xf32>
    %c0_2 = arith.constant 0 : index
    %c0_3 = arith.constant 0 : index
    %4 = vector.load %arg3[%c0_2, %c0_3] : memref<128x128xf32, #tpu.memory_space<vmem>>, vector<128x128xf32>
    %cst = arith.constant dense<0.000000e+00> : vector<16x128xf32>
    %5 = tpu.matmul %3, %4, %cst {dimension_numbers = #tpu.dot_dimension_numbers<[1], [0], [0], [1], [0, 0, 1, 1], [], []>} : vector<16x128xf32>, vector<128x128xf32>, vector<16x128xf32> -> vector<16x128xf32>
    %c0_4 = arith.constant 0 : index
    %c0_5 = arith.constant 0 : index
    %6 = vector.load %arg5[%c0_4, %c0_5] : memref<1x128xf32, #tpu.memory_space<vmem>>, vector<1x128xf32>
    %7 = vector.broadcast %6 : vector<1x128xf32> to vector<16x128xf32>
    %8 = arith.addf %5, %7 : vector<16x128xf32>
    %c0_6 = arith.constant 0 : index
    %c0_7 = arith.constant 0 : index
    %9 = vector.load %arg4[%c0_6, %c0_7] : memref<128x128xf32, #tpu.memory_space<vmem>>, vector<128x128xf32>
    %cst_8 = arith.constant dense<0.000000e+00> : vector<16x128xf32>
    %10 = tpu.matmul %3, %9, %cst_8 {dimension_numbers = #tpu.dot_dimension_numbers<[1], [0], [0], [1], [0, 0, 1, 1], [], []>} : vector<16x128xf32>, vector<128x128xf32>, vector<16x128xf32> -> vector<16x128xf32>
    %c0_9 = arith.constant 0 : index
    %c0_10 = arith.constant 0 : index
    %11 = vector.load %arg6[%c0_9, %c0_10] : memref<1x128xf32, #tpu.memory_space<vmem>>, vector<1x128xf32>
    %12 = vector.broadcast %11 : vector<1x128xf32> to vector<16x128xf32>
    %13 = arith.addf %10, %12 : vector<16x128xf32>
    %cst_11 = arith.constant 5.000000e-01 : f32
    %14 = vector.broadcast %cst_11 : f32 to vector<16x128xf32>
    %15 = arith.mulf %14, %13 : vector<16x128xf32>
    %cst_12 = arith.constant 0.707106769 : f32
    %16 = vector.broadcast %cst_12 : f32 to vector<16x128xf32>
    %17 = arith.mulf %13, %16 : vector<16x128xf32>
    %18 = math.erf %17 : vector<16x128xf32>
    %cst_13 = arith.constant 1.000000e+00 : f32
    %19 = vector.broadcast %cst_13 : f32 to vector<16x128xf32>
    %20 = arith.addf %19, %18 : vector<16x128xf32>
    %21 = arith.mulf %15, %20 : vector<16x128xf32>
    %22 = arith.mulf %8, %21 : vector<16x128xf32>
    %c0_14 = arith.constant 0 : index
    %c0_15 = arith.constant 0 : index
    %23 = vector.load %arg10[%c0_14, %c0_15] : memref<16x128xf32, #tpu.memory_space<vmem>>, vector<16x128xf32>
    %c0_16 = arith.constant 0 : index
    %c0_17 = arith.constant 0 : index
    %24 = vector.load %arg7[%c0_16, %c0_17] : memref<128x128xf32, #tpu.memory_space<vmem>>, vector<128x128xf32>
    %cst_18 = arith.constant dense<0.000000e+00> : vector<16x128xf32>
    %25 = tpu.matmul %22, %24, %cst_18 {dimension_numbers = #tpu.dot_dimension_numbers<[1], [0], [0], [1], [0, 0, 1, 1], [], []>} : vector<16x128xf32>, vector<128x128xf32>, vector<16x128xf32> -> vector<16x128xf32>
    %26 = arith.addf %23, %25 : vector<16x128xf32>
    %c0_19 = arith.constant 0 : index
    %c0_20 = arith.constant 0 : index
    %27 = vector.load %arg10[%c0_19, %c0_20] : memref<16x128xf32, #tpu.memory_space<vmem>>, vector<16x128xf32>
    tpu.vector_store %arg10[%c0_19, %c0_20], %26 {strides = array<i32>} : memref<16x128xf32, #tpu.memory_space<vmem>>, vector<16x128xf32>,
    %c0_i32_21 = arith.constant 0 : i32
    %28 = arith.cmpi eq, %arg1, %c0_i32_21 : i32
    %29 = arith.extui %28 : i1 to i32
    %c0_i32_22 = arith.constant 0 : i32
    %30 = arith.cmpi ne, %29, %c0_i32_22 : i32
    scf.if %30 {
      %c0_23 = arith.constant 0 : index
      %c0_24 = arith.constant 0 : index
      %31 = vector.load %arg10[%c0_23, %c0_24] : memref<16x128xf32, #tpu.memory_space<vmem>>, vector<16x128xf32>
      %c0_25 = arith.constant 0 : index
      %c0_26 = arith.constant 0 : index
      %32 = vector.load %arg9[%c0_25, %c0_26] : memref<16x128xf32, #tpu.memory_space<vmem>>, vector<16x128xf32>
      tpu.vector_store %arg9[%c0_25, %c0_26], %31 {strides = array<i32>} : memref<16x128xf32, #tpu.memory_space<vmem>>, vector<16x128xf32>,
    } else {
    }
    return
  }
  func.func @transform_0(%arg0: i32, %arg1: i32) -> (i32, i32) {
    %c0_i32 = arith.constant 0 : i32
    %c0_i32_0 = arith.constant 0 : i32
    return %arg0, %c0_i32 : i32, i32
  }
  func.func @transform_1(%arg0: i32, %arg1: i32) -> (i32, i32) {
    %c0_i32 = arith.constant 0 : i32
    %c0_i32_0 = arith.constant 0 : i32
    return %c0_i32, %arg1 : i32, i32
  }
  func.func @transform_2(%arg0: i32, %arg1: i32) -> (i32, i32) {
    %c0_i32 = arith.constant 0 : i32
    %c0_i32_0 = arith.constant 0 : i32
    return %c0_i32, %arg1 : i32, i32
  }
  func.func @transform_3(%arg0: i32, %arg1: i32) -> (i32, i32) {
    %c0_i32 = arith.constant 0 : i32
    %c0_i32_0 = arith.constant 0 : i32
    return %c0_i32, %arg1 : i32, i32
  }
  func.func @transform_4(%arg0: i32, %arg1: i32) -> (i32, i32) {
    %c0_i32 = arith.constant 0 : i32
    %c0_i32_0 = arith.constant 0 : i32
    return %c0_i32, %arg1 : i32, i32
  }
  func.func @transform_5(%arg0: i32, %arg1: i32) -> (i32, i32) {
    %c0_i32 = arith.constant 0 : i32
    %c0_i32_0 = arith.constant 0 : i32
    return %arg1, %c0_i32 : i32, i32
  }
  func.func @transform_6(%arg0: i32, %arg1: i32) -> (i32, i32) {
    %c0_i32 = arith.constant 0 : i32
    %c0_i32_0 = arith.constant 0 : i32
    %c0_i32_1 = arith.constant 0 : i32
    return %c0_i32, %c0_i32_0 : i32, i32
  }
  func.func @transform_7(%arg0: i32, %arg1: i32) -> (i32, i32) {
    %c0_i32 = arith.constant 0 : i32
    %c0_i32_0 = arith.constant 0 : i32
    return %arg0, %c0_i32 : i32, i32
  }
}

</mosaic_0001>

<bundles_post_ra>
// kernel: _mlp_forward_jit.1
= control target key start
LH: loop header
LB: loop body
LE: loop exit
PB: predicated region body
PF: predicated region fallthrough
CT: control target
= control target key end

     0   :  { %12 = vsyncpa [#allocation4], 0  ;;  %s710_s0 = inlined_call_operand.vmem [shape: f32[16,128], index: 0, kind: input, shape index: {}]   ;;  %s711_s1 = inlined_call_operand.hbm [shape: f32[128,128], index: 1, kind: input, shape index: {}]   ;;  %s712_s2 = inlined_call_operand.hbm [shape: f32[128,128], index: 2, kind: input, shape index: {}]   ;;  %s713_s3 = inlined_call_operand.vmem [shape: f32[1,128], index: 3, kind: input, shape index: {}]   ;;  %s714_s4 = inlined_call_operand.vmem [shape: f32[1,128], index: 4, kind: input, shape index: {}]   ;;  %s715_s5 = inlined_call_operand.hbm [shape: f32[128,128], index: 5, kind: input, shape index: {}]   ;;  %s716_s6 = inlined_call_operand.vmem [shape: f32[1,128], index: 6, kind: input, shape index: {}]   ;;  %s717_s7 = inlined_call_operand.vmem [shape: f32[16,128], index: 7, kind: output, shape index: {}]  }
   0x1   :  { %13 = vsyncpa [#allocation6], 0  ;;  %s635_s24 = smov [#allocation5]   ;;  %s636_s26 = smov [#allocation3]  }
   0x2   :  { %s33_s25 = sshll.u32 %s635_s24, 4  ;;  %s21_s27 = sshll.u32 %s636_s26, 4  ;;  %s34_s25 = int_to_ptr.vmem [resolvable:$true] %s33_s25  ;;  %s22_s27 = int_to_ptr.vmem [resolvable:$true] %s21_s27 }
   0x3   :  { %s579_s28 = scalar_lea.vmem %s34_s25, 2048  ;;  %p584_p1 = scmp.lt.s32.totalorder %s34_s25, %s34_s25 }
   0x4   :  { %p580_p0 = scmp.ne.s32.totalorder %s34_s25, %s579_s28  ;;  %p585_p2 = scmp.lt.s32.totalorder %s579_s28, %s579_s28 }
   0x6   :  { %p586_p3 = por %p585_p2, %p584_p1 }
   0x8   :  { %p587_p4 = pnand %p586_p3, %p580_p0 }
   0xa   :  { %590 = shalt.err (!%p587_p4)
}
   0xb   :  { %s637_s29 = smov 128   ;;  %s638_s30 = smov 8  }
   0xc   :  { %39 = dma.hbm_to_vmem [thread:$0]  %s712_s2, 2048, %s34_s25, [#allocation6], %s637_s29, %s637_s29, %s638_s30  }
   0xd   :  { %s599_s10 = scalar_lea.vmem %s22_s27, 2048  ;;  %p604_p6 = scmp.lt.s32.totalorder %s22_s27, %s22_s27 }
   0xe   :  { %p600_p5 = scmp.ne.s32.totalorder %s22_s27, %s599_s10  ;;  %p605_p7 = scmp.lt.s32.totalorder %s599_s10, %s599_s10 }
  0x10   :  { %p606_p8 = por %p605_p7, %p604_p6 }
  0x12   :  { %p607_p9 = pnand %p606_p8, %p600_p5 }
  0x14   :  { %610 = shalt.err (!%p607_p9)
}
  0x15   :  { %27 = dma.hbm_to_vmem [thread:$0]  %s711_s1, 2048, %s22_s27, [#allocation4], %s637_s29, %s637_s29, %s638_s30  }
  0x16   :  { %s639_s13 = smov [#allocation7]  }
  0x17   :  { %s49_s14 = sshll.u32 %s639_s13, 4  ;;  %s50_s14 = int_to_ptr.vmem [resolvable:$true] %s49_s14 }
  0x18   :  { %s619_s15 = scalar_lea.vmem %s50_s14, 2048  ;;  %p624_p11 = scmp.lt.s32.totalorder %s50_s14, %s50_s14 }
  0x19   :  { %p620_p10 = scmp.ne.s32.totalorder %s50_s14, %s619_s15  ;;  %p625_p12 = scmp.lt.s32.totalorder %s619_s15, %s619_s15 }
  0x1b   :  { %p626_p13 = por %p625_p12, %p624_p11 }
  0x1d   :  { %p627_p0 = pnand %p626_p13, %p620_p10 }
  0x1f   :  { %630 = shalt.err (!%p627_p0)
}
  0x20   :  { %55 = dma.hbm_to_vmem [thread:$0]  %s715_s5, 2048, %s50_s14, [#allocation6], %s637_s29, %s637_s29, %s638_s30  }
  0x21   :  { %631 = dma.done.wait [#allocation4], 2048  }
  0x22   :  { %632 = vsyncadd [#allocation4], 4294965248 }
  0x23   :  { %633 = dma.done.wait [#allocation6], 4096  }
  0x24   :  { %634 = vsyncadd [#allocation6], 4294963200  ;;  %v195_v0 = vld [vmem:[#allocation5 + $0x78] sm:$0xff]  ;;  %v194_v1 = vld [vmem:[#allocation5 + $0x70] sm:$0xff] }
  0x25   :  { %492 = vmatprep.subr.mxu1 %v195_v0  ;;  %v193_v2 = vld [vmem:[#allocation5 + $0x68] sm:$0xff]  ;;  %v97_v3 = vld [vmem:[#allocation3 + $0x78] sm:$0xff]  ;;  %v96_v4 = vld [vmem:[#allocation3 + $0x70] sm:$0xff] }
  0x26   :  { %493 = vmatpush3.msra.mxu1 %v195_v0  ;;  %v192_v5 = vld [vmem:[#allocation5 + $0x60] sm:$0xff]  ;;  %457 = vmatprep.subr.mxu0 %v97_v3  ;;  %v95_v6 = vld [vmem:[#allocation3 + $0x68] sm:$0xff]  ;;  %v191_v7 = vld [vmem:[#allocation5 + $0x58] sm:$0xff] }
  0x27   :  { %494 = vmatprep.subr.mxu1 %v194_v1  ;;  %458 = vmatpush3.msra.mxu0 %v97_v3  ;;  %v94_v8 = vld [vmem:[#allocation3 + $0x60] sm:$0xff]  ;;  %v190_v9 = vld [vmem:[#allocation5 + $0x50] sm:$0xff]  ;;  %v93_v10 = vld [vmem:[#allocation3 + $0x58] sm:$0xff] }
  0x28   :  { %495 = vmatpush3.msra.mxu1 %v194_v1  ;;  %459 = vmatprep.subr.mxu0 %v96_v4  ;;  %v189_v11 = vld [vmem:[#allocation5 + $0x48] sm:$0xff]  ;;  %v92_v12 = vld [vmem:[#allocation3 + $0x50] sm:$0xff]  ;;  %v188_v13 = vld [vmem:[#allocation5 + $0x40] sm:$0xff] }
  0x29   :  { %496 = vmatprep.subr.mxu1 %v193_v2  ;;  %460 = vmatpush3.msra.mxu0 %v96_v4  ;;  %v91_v14 = vld [vmem:[#allocation3 + $0x48] sm:$0xff]  ;;  %v187_v15 = vld [vmem:[#allocation5 + $0x38] sm:$0xff]  ;;  %v80_v16 = vld [vmem:[%s710_s0] sm:$0xff] }
  0x2a   :  { %497 = vmatpush3.msra.mxu1 %v193_v2  ;;  %461 = vmatprep.subr.mxu0 %v95_v6  ;;  %v186_v17 = vld [vmem:[#allocation5 + $0x30] sm:$0xff]  ;;  %v90_v18 = vld [vmem:[#allocation3 + $0x40] sm:$0xff]  ;;  %v185_v19 = vld [vmem:[#allocation5 + $0x28] sm:$0xff] }
  0x2b   :  { %498 = vmatprep.subr.mxu1 %v192_v5  ;;  %462 = vmatpush3.msra.mxu0 %v95_v6  ;;  %v89_v20 = vld [vmem:[#allocation3 + $0x38] sm:$0xff]  ;;  %v184_v21 = vld [vmem:[#allocation5 + $0x20] sm:$0xff]  ;;  %v88_v22 = vld [vmem:[#allocation3 + $0x30] sm:$0xff] }
  0x2c   :  { %499 = vmatpush3.msra.mxu1 %v192_v5  ;;  %463 = vmatprep.subr.mxu0 %v94_v8  ;;  %v183_v23 = vld [vmem:[#allocation5 + $0x18] sm:$0xff]  ;;  %v87_v24 = vld [vmem:[#allocation3 + $0x28] sm:$0xff]  ;;  %v182_v25 = vld [vmem:[#allocation5 + $0x10] sm:$0xff] }
  0x2d   :  { %500 = vmatprep.subr.mxu1 %v191_v7  ;;  %464 = vmatpush3.msra.mxu0 %v94_v8  ;;  %v86_v26 = vld [vmem:[#allocation3 + $0x20] sm:$0xff]  ;;  %v181_v27 = vld [vmem:[#allocation5 + $0x8] sm:$0xff]  ;;  %v85_v28 = vld [vmem:[#allocation3 + $0x18] sm:$0xff] }
  0x2e   :  { %501 = vmatpush3.msra.mxu1 %v191_v7  ;;  %465 = vmatprep.subr.mxu0 %v93_v10  ;;  %v180_v29 = vld [vmem:[#allocation5] sm:$0xff]  ;;  %v84_v30 = vld [vmem:[#allocation3 + $0x10] sm:$0xff]  ;;  %v81_v31 = vld [vmem:[%s710_s0 + $0x8] sm:$0xff] }
  0x2f   :  { %502 = vmatprep.subr.mxu1 %v190_v9  ;;  %466 = vmatpush3.msra.mxu0 %v93_v10  ;;  %v83_v32 = vld [vmem:[#allocation3 + $0x8] sm:$0xff]  ;;  %v82_v33 = vld [vmem:[#allocation3] sm:$0xff]  ;;  %v307_v34 = vld [vmem:[#allocation7 + $0x78] sm:$0xff] }
  0x30   :  { %503 = vmatpush3.msra.mxu1 %v190_v9  ;;  %467 = vmatprep.subr.mxu0 %v92_v12  ;;  %v306_v35 = vld [vmem:[#allocation7 + $0x70] sm:$0xff]  ;;  %v305_v36 = vld [vmem:[#allocation7 + $0x68] sm:$0xff]  ;;  %v304_v37 = vld [vmem:[#allocation7 + $0x60] sm:$0xff] }
  0x31   :  { %504 = vmatprep.subr.mxu1 %v189_v11  ;;  %468 = vmatpush3.msra.mxu0 %v92_v12  ;;  %v303_v38 = vld [vmem:[#allocation7 + $0x58] sm:$0xff]  ;;  %v302_v39 = vld [vmem:[#allocation7 + $0x50] sm:$0xff]  ;;  %v301_v40 = vld [vmem:[#allocation7 + $0x48] sm:$0xff] }
  0x32   :  { %505 = vmatpush3.msra.mxu1 %v189_v11  ;;  %469 = vmatprep.subr.mxu0 %v91_v14  ;;  %v300_v41 = vld [vmem:[#allocation7 + $0x40] sm:$0xff]  ;;  %v299_v42 = vld [vmem:[#allocation7 + $0x38] sm:$0xff]  ;;  %v298_v43 = vld [vmem:[#allocation7 + $0x30] sm:$0xff] }
  0x33   :  { %506 = vmatprep.subr.mxu1 %v188_v13  ;;  %470 = vmatpush3.msra.mxu0 %v91_v14  ;;  %v297_v44 = vld [vmem:[#allocation7 + $0x28] sm:$0xff]  ;;  %v296_v45 = vld [vmem:[#allocation7 + $0x20] sm:$0xff]  ;;  %v295_v46 = vld [vmem:[#allocation7 + $0x18] sm:$0xff] }
  0x34   :  { %507 = vmatpush3.msra.mxu1 %v188_v13  ;;  %524 = vmatprep.mubr.f32.mxu1 %v80_v16  ;;  %v294_v47 = vld [vmem:[#allocation7 + $0x10] sm:$0xff]  ;;  %v293_v48 = vld [vmem:[#allocation7 + $0x8] sm:$0xff]  ;;  %v292_v49 = vld [vmem:[#allocation7] sm:$0xff] }
  0x35   :  { %508 = vmatprep.subr.mxu1 %v187_v15  ;;  %471 = vmatprep.subr.mxu0 %v90_v18  ;;  %v402_v50 = vld [vmem:[%s714_s4] ss:$0 sm:$0xff] }
  0x36   :  { %509 = vmatpush3.msra.mxu1 %v187_v15  ;;  %472 = vmatpush3.msra.mxu0 %v90_v18  ;;  %v401_v59 = vld [vmem:[%s713_s3] ss:$0 sm:$0xff] }
  0x37   :  { %510 = vmatprep.subr.mxu1 %v186_v17  ;;  %473 = vmatprep.subr.mxu0 %v89_v20  ;;  %v400_v8 = vld [vmem:[%s716_s6] ss:$0 sm:$0xff] }
  0x38   :  { %511 = vmatpush3.msra.mxu1 %v186_v17  ;;  %474 = vmatpush3.msra.mxu0 %v89_v20 }
  0x39   :  { %512 = vmatprep.subr.mxu1 %v185_v19  ;;  %475 = vmatprep.subr.mxu0 %v88_v22 }
  0x3a   :  { %513 = vmatpush3.msra.mxu1 %v185_v19  ;;  %476 = vmatpush3.msra.mxu0 %v88_v22 }
  0x3b   :  { %514 = vmatprep.subr.mxu1 %v184_v21  ;;  %477 = vmatprep.subr.mxu0 %v87_v24 }
  0x3c   :  { %515 = vmatpush3.msra.mxu1 %v184_v21  ;;  %478 = vmatpush3.msra.mxu0 %v87_v24 }
  0x3d   :  { %516 = vmatprep.subr.mxu1 %v183_v23  ;;  %479 = vmatprep.subr.mxu0 %v86_v26 }
  0x3e   :  { %517 = vmatpush3.msra.mxu1 %v183_v23  ;;  %480 = vmatpush3.msra.mxu0 %v86_v26 }
  0x3f   :  { %518 = vmatprep.subr.mxu1 %v182_v25  ;;  %481 = vmatprep.subr.mxu0 %v85_v28 }
  0x40   :  { %519 = vmatpush3.msra.mxu1 %v182_v25  ;;  %482 = vmatpush3.msra.mxu0 %v85_v28 }
  0x41   :  { %520 = vmatprep.subr.mxu1 %v181_v27  ;;  %483 = vmatprep.subr.mxu0 %v84_v30 }
  0x42   :  { %521 = vmatpush3.msra.mxu1 %v181_v27  ;;  %484 = vmatpush3.msra.mxu0 %v84_v30 }
  0x43   :  { %522 = vmatprep.subr.mxu1 %v180_v29  ;;  %485 = vmatprep.subr.mxu0 %v83_v32 }
  0x44   :  { %523 = vmatpush3.msra.mxu1 %v180_v29  ;;  %486 = vmatpush3.msra.mxu0 %v83_v32 }
  0x45   :  { %525 = vmatmul.mubr.f32.vlgmr.msra.gmra.mxu1 %v81_v31  ;;  %489 = vmatprep.mubr.f32.mxu0 %v80_v16 }
  0x46   :  { %487 = vmatprep.subr.mxu0 %v82_v33 }
  0x47   :  { %488 = vmatpush3.msra.mxu0 %v82_v33 }
  0x48   :  { %490 = vmatmul.mubr.f32.vlgmr.msra.gmra.mxu0 %v81_v31  ;;  %527 = vmatprep.subr.mxu0 %v307_v34 }
  0x49   :  { %528 = vmatpush3.msra.mxu0 %v307_v34 }
  0x4a   :  { %529 = vmatprep.subr.mxu0 %v306_v35 }
  0x4b   :  { %530 = vmatpush3.msra.mxu0 %v306_v35 }
  0x4c   :  { %531 = vmatprep.subr.mxu0 %v305_v36 }
  0x4d   :  { %532 = vmatpush3.msra.mxu0 %v305_v36 }
  0x4e   :  { %533 = vmatprep.subr.mxu0 %v304_v37 }
  0x4f   :  { %534 = vmatpush3.msra.mxu0 %v304_v37 }
  0x50   :  { %535 = vmatprep.subr.mxu0 %v303_v38 }
  0x51   :  { %536 = vmatpush3.msra.mxu0 %v303_v38 }
  0x52   :  { %537 = vmatprep.subr.mxu0 %v302_v39 }
  0x53   :  { %538 = vmatpush3.msra.mxu0 %v302_v39 }
  0x54   :  { %539 = vmatprep.subr.mxu0 %v301_v40 }
  0x55   :  { %540 = vmatpush3.msra.mxu0 %v301_v40 }
  0x56   :  { %541 = vmatprep.subr.mxu0 %v300_v41 }
  0x57   :  { %542 = vmatpush3.msra.mxu0 %v300_v41 }
  0x58   :  { %543 = vmatprep.subr.mxu0 %v299_v42 }
  0x59   :  { %544 = vmatpush3.msra.mxu0 %v299_v42 }
  0x5a   :  { %545 = vmatprep.subr.mxu0 %v298_v43 }
  0x5b   :  { %546 = vmatpush3.msra.mxu0 %v298_v43 }
  0x5c   :  { %547 = vmatprep.subr.mxu0 %v297_v44 }
  0x5d   :  { %548 = vmatpush3.msra.mxu0 %v297_v44 }
  0x5e   :  { %549 = vmatprep.subr.mxu0 %v296_v45 }
  0x5f   :  { %550 = vmatpush3.msra.mxu0 %v296_v45 }
  0x60   :  { %551 = vmatprep.subr.mxu0 %v295_v46 }
  0x61   :  { %552 = vmatpush3.msra.mxu0 %v295_v46 }
  0x62   :  { %553 = vmatprep.subr.mxu0 %v294_v47 }
  0x63   :  { %554 = vmatpush3.msra.mxu0 %v294_v47 }
  0x64   :  { %555 = vmatprep.subr.mxu0 %v293_v48 }
  0x65   :  { %556 = vmatpush3.msra.mxu0 %v293_v48 }
  0x66   :  { %557 = vmatprep.subr.mxu0 %v292_v49 }
  0x67   :  { %558 = vmatpush3.msra.mxu0 %v292_v49 }
 0x105   :  { %v526_v51 = vpop.f32.mrf.mxu1 }
 0x106   :  { %v275_v52 = vadd.f32 %v526_v51, %v402_v50 }
 0x107   :  { %v269_v53 = vpop.f32.mrf.mxu1 }
 0x108   :  { %v281_v54 = vmul.f32 0.70710677, %v275_v52  ;;  %v270_v55 = vadd.f32 %v402_v50, %v269_v53  ;;  %v491_v57 = vpop.f32.mrf.mxu0  ;;  %v279_v62 = vmul.f32 0.5, %v275_v52 }
 0x109   :  { %v177_v2 = vadd.f32 %v491_v57, %v401_v59 }
 0x10a   :  { %567 = verf.f32 %v281_v54  ;;  %v280_v56 = vmul.f32 0.70710677, %v270_v55  ;;  %v171_v63 = vpop.f32.mrf.mxu0  ;;  %v278_v0 = vmul.f32 0.5, %v270_v55 }
 0x10b   :  { %v172_v4 = vadd.f32 %v401_v59, %v171_v63 }
 0x10c   :  { %569 = verf.f32 %v280_v56 }
 0x117   :  { %v568_v58 = vpop.eup %567 }
 0x118   :  { %v285_v60 = vadd.f32 1.0, %v568_v58 }
 0x119   :  { %v570_v61 = vpop.eup %569 }
 0x11a   :  { %v284_v1 = vadd.f32 1.0, %v570_v61  ;;  %v287_v3 = vmul.f32 %v285_v60, %v279_v62 }
 0x11c   :  { %v286_v5 = vmul.f32 %v284_v1, %v278_v0  ;;  %v289_v7 = vmul.f32 %v287_v3, %v177_v2 }
 0x11e   :  { %v288_v6 = vmul.f32 %v286_v5, %v172_v4 }
 0x120   :  { %559 = vmatprep.mubr.f32.mxu0 %v288_v6 }
 0x121   :  { %560 = vmatmul.mubr.f32.vlgmr.msra.gmra.mxu0 %v289_v7 }
 0x1e1   :  { %v561_v9 = vpop.f32.mrf.mxu0 }
 0x1e2   :  { %v384_v10 = vadd.f32 %v561_v9, %v400_v8 }
 0x1e3   :  { %v374_v11 = vpop.f32.mrf.mxu0 }
 0x1e4   :  { %393 = vst [vmem:[%s717_s7 + $0x8] sm:$0xff] %v384_v10  ;;  %v383_v12 = vadd.f32 %v400_v8, %v374_v11 }
 0x1e6   :  { %392 = vst [vmem:[%s717_s7] sm:$0xff] %v383_v12 }
 0x1e7   :  { %398 = vsyncpa [#allocation4], 1 }
 0x1e8   :  { %399 = vsyncpa [#allocation6], 1 }

</bundles_post_ra>
